<compile_context>
chip_gen: v7x
topology: tpu7x:2x2x1
jax: 0.10.0
libtpu: 0.0.40
codegen_flags: <defaults>
</compile_context>

<pallas_src>
import functools

import jax
import jax.numpy as jnp
from jax.experimental import pallas as pl
from jax.experimental.pallas import tpu as pltpu

LANE = 128
CHUNK = 64          # sub-chunk rows: keeps live intermediates within 64 vregs
PAD_LOGIT = -1e4    # pred pad value -> per-element loss of padded entries == 0


def _round_up(x, m):
    return ((x + m - 1) // m) * m


def _vfl_partial_sum_kernel(pred_ref, tgt_ref, out_ref, *, alpha, gamma,
                            iou_weighted, chunk):
    k = pl.program_id(1)

    @pl.when(k == 0)
    def _():
        out_ref[...] = jnp.zeros_like(out_ref)

    tm = pred_ref.shape[0]

    def chunk_loss_sum(r0, nrows):
        x = pred_ref[pl.ds(r0, nrows), :].astype(jnp.float32)
        t = tgt_ref[pl.ds(r0, nrows), :].astype(jnp.float32)
        # Fused transcendentals: one exp + one log1p (+ one approx rcp on the
        # EUP) per element.
        #   e = exp(-|x|);  sigmoid(x) = where(x>=0, 1, e) * rcp(1+e)
        #   stable BCE log term = log1p(e)
        e = jnp.exp(-jnp.abs(x))
        log1p_e = jnp.log1p(e)
        sig = jnp.where(x >= 0.0, 1.0, e) * pl.reciprocal(1.0 + e, approx=True)
        d = jnp.abs(sig - t)
        dg = d * d if gamma == 2.0 else jnp.power(d, gamma)  # static special case
        # Single-select focal weight (NaN targets count as negatives, same as
        # "not > 0"; reference drops them from both branches — documented).
        fw = jnp.where(t > 0.0, t if iou_weighted else 1.0, alpha * dg)
        # Numerically stable binary_cross_entropy_with_logits, reduction='none'.
        bce = jnp.maximum(x, 0.0) - x * t + log1p_e
        loss = bce * fw
        # (nrows,128) -> (nrows//8, 8, 128): sum over leading axis is pure
        # vreg VPU adds (no cross-lane XLU work on the hot path).
        return loss.reshape(nrows // 8, 8, LANE).sum(axis=0)

    n_full = tm // chunk
    rem = tm - n_full * chunk          # static; always a multiple of 8

    acc = jnp.zeros((8, LANE), jnp.float32)
    if n_full > 0:
        def body(c, a):
            r0 = pl.multiple_of(c * chunk, 8)
            return a + chunk_loss_sum(r0, chunk)
        acc = jax.lax.fori_loop(0, n_full, body, acc)
    if rem:
        acc = acc + chunk_loss_sum(n_full * chunk, rem)

    out_ref[0, :, :] += acc


def varifocal_loss_pallas(pred, target, *, alpha=0.75, gamma=2.0,
                          iou_weighted=True, reduction="mean",
                          loss_weight=1.0, avg_factor=None,
                          tm=2048, num_parallel=2, chunk=CHUNK):
    assert pred.shape == target.shape
    total = int(pred.size)
    assert total > 0

    # No wrapper-side dtype cast: bf16 inputs pass straight through (kernel
    # upcasts), halving HBM traffic on the mem-bound configurations.
    pred_flat = pred.reshape(-1)
    tgt_flat = target.reshape(-1)

    m = -(-total // LANE)                              # 128-lane rows (ceil)
    np_eff = int(num_parallel) if m >= 8 * int(num_parallel) else 1
    rows_per_core = -(-m // np_eff)
    tm = max(8, _round_up(int(tm), 8))
    tm_eff = min(tm, _round_up(rows_per_core, 8))
    nk = -(-rows_per_core // tm_eff)
    tm_eff = _round_up(-(-rows_per_core // nk), 8)     # rebalance -> tiny pad
    m_pad = np_eff * nk * tm_eff
    total_pad = m_pad * LANE

    if total_pad != total:
        pad = total_pad - total
        # Padded elements contribute EXACTLY 0 loss (pred=-1e4, target=0), so
        # the kernel needs no tail mask at all.  XLA fuses this pad with the
        # flatten/relayout copy below.
        pred_flat = jnp.pad(pred_flat, (0, pad), constant_values=PAD_LOGIT)
        tgt_flat = jnp.pad(tgt_flat, (0, pad), constant_values=0.0)

    pred2 = pred_flat.reshape(m_pad, LANE)
    tgt2 = tgt_flat.reshape(m_pad, LANE)

    grid = (np_eff, nk)
    kernel = functools.partial(
        _vfl_partial_sum_kernel, alpha=float(alpha), gamma=float(gamma),
        iou_weighted=bool(iou_weighted), chunk=int(chunk))

    in_map = lambda p, k, _nk=nk: (p * _nk + k, 0)
    bytes_in = (pred2.size * pred2.dtype.itemsize
                + tgt2.size * tgt2.dtype.itemsize)

    partial = pl.pallas_call(
        kernel,
        out_shape=jax.ShapeDtypeStruct((np_eff, 8, LANE), jnp.float32),
        grid_spec=pltpu.PrefetchScalarGridSpec(
            num_scalar_prefetch=0,
            grid=grid,
            in_specs=[
                pl.BlockSpec((tm_eff, LANE), in_map),
                pl.BlockSpec((tm_eff, LANE), in_map),
            ],
            out_specs=pl.BlockSpec((1, 8, LANE), lambda p, k: (p, 0, 0)),
        ),
        compiler_params=pltpu.CompilerParams(
            dimension_semantics=("parallel", "arbitrary")),
        cost_estimate=pl.CostEstimate(
            flops=16 * total_pad,
            transcendentals=3 * total_pad,
            bytes_accessed=bytes_in + np_eff * 8 * LANE * 4),
    )(pred2, tgt2)

    loss_sum = jnp.sum(partial)

    if avg_factor is None:
        if reduction == "mean":
            loss = loss_sum / jnp.float32(total)
        elif reduction == "sum":
            loss = loss_sum
        else:
            # TODO(synk): reduction='none' (per-element output) and per-element
            # `weight` would need an elementwise-output kernel variant.
            raise NotImplementedError("reduction='none' is not supported")
    else:
        if reduction == "mean":
            loss = loss_sum / jnp.float32(avg_factor)
        elif reduction == "none":
            raise NotImplementedError("reduction='none' is not supported")
        else:
            raise ValueError('avg_factor can not be used with reduction="sum"')
    return jnp.float32(loss_weight) * loss


class VarifocalLossPallas:
    def __init__(self, use_sigmoid=True, alpha=0.75, gamma=2.0,
                 iou_weighted=True, reduction="mean", loss_weight=1.0):
        assert use_sigmoid is True
        assert alpha >= 0.0
        self.alpha = alpha
        self.gamma = gamma
        self.iou_weighted = iou_weighted
        self.reduction = reduction
        self.loss_weight = loss_weight

    def __call__(self, pred, target, weight=None, avg_factor=None,
                 reduction_override=None):
        assert reduction_override in (None, "none", "mean", "sum")
        assert weight is None  # TODO(synk): per-element weight not supported.
        reduction = reduction_override if reduction_override else self.reduction
        return varifocal_loss_pallas(
            pred, target, alpha=self.alpha, gamma=self.gamma,
            iou_weighted=self.iou_weighted, reduction=reduction,
            loss_weight=self.loss_weight, avg_factor=avg_factor)


def _reference_vfl(pred, target, alpha=0.75, gamma=2.0, iou_weighted=True,
                   reduction="mean"):
    x = pred.astype(jnp.float32)
    t = target.astype(jnp.float32)
    sig = jax.nn.sigmoid(x)
    pos = (t > 0.0).astype(jnp.float32)
    neg = (t <= 0.0).astype(jnp.float32)
    fw = (t * pos if iou_weighted else pos) + alpha * jnp.abs(sig - t) ** gamma * neg
    bce = jnp.maximum(x, 0.0) - x * t + jnp.log1p(jnp.exp(-jnp.abs(x)))
    loss = bce * fw
    return jnp.mean(loss) if reduction == "mean" else jnp.sum(loss)


if __name__ == "__main__":
    key = jax.random.PRNGKey(0)
    k1, k2, k3, k4, k5, k6 = jax.random.split(key, 6)

    loss_mod = VarifocalLossPallas(alpha=0.75, gamma=2.0, iou_weighted=True,
                                   reduction="mean", loss_weight=1.0)

    # Tolerances account for the approx reciprocal in the in-kernel sigmoid
    # (perturbs only the negatives' focal weight, <~1e-3 relative overall).
    RTOL, ATOL = 2e-3, 1e-5

    # Test 1: NCHW logits (batch=2, classes=4, spatial=16x16), exact 128-fit.
    pred = jax.random.normal(k1, (2, 4, 16, 16), dtype=jnp.float32) * 2.0
    scores = jax.random.uniform(k2, (2, 4, 16, 16), dtype=jnp.float32)
    mask = (jax.random.uniform(k3, (2, 4, 16, 16)) < 0.25).astype(jnp.float32)
    target = scores * mask

    out = jax.block_until_ready(loss_mod(pred, target))
    ref = jax.block_until_ready(_reference_vfl(pred, target))
    assert jnp.allclose(out, ref, rtol=RTOL, atol=ATOL), (out, ref)

    out_sum = jax.block_until_ready(
        loss_mod(pred, target, reduction_override="sum"))
    ref_sum = jax.block_until_ready(
        _reference_vfl(pred, target, reduction="sum"))
    assert jnp.allclose(out_sum, ref_sum, rtol=RTOL, atol=1e-3), (out_sum, ref_sum)

    # Test 2: awkward (non-128-divisible) shape exercises the zero-loss
    # padding path (no in-kernel masking needed).
    pred_b = jax.random.normal(k4, (3, 5, 7, 11), dtype=jnp.float32) * 2.0
    scores_b = jax.random.uniform(k5, (3, 5, 7, 11), dtype=jnp.float32)
    mask_b = (jax.random.uniform(k6, (3, 5, 7, 11)) < 0.25).astype(jnp.float32)
    target_b = scores_b * mask_b

    out_b = jax.block_until_ready(loss_mod(pred_b, target_b))
    ref_b = jax.block_until_ready(_reference_vfl(pred_b, target_b))
    assert jnp.allclose(out_b, ref_b, rtol=RTOL, atol=ATOL), (out_b, ref_b)

    print("KERNEL_OK")
</pallas_src>

<mosaic_0001>
module attributes {stable_mosaic.version = 11 : i64} {
  func.func @_vfl_partial_sum_kernel(%arg0: i32, %arg1: i32, %arg2: memref<8x128xf32, #tpu.memory_space<vmem>>, %arg3: memref<8x128xf32, #tpu.memory_space<vmem>>, %arg4: memref<1x8x128xf32, #tpu.memory_space<vmem>>) attributes {dimension_semantics = [#tpu.dimension_semantics<parallel>, #tpu.dimension_semantics<arbitrary>], iteration_bounds = array<i64: 2, 1>, scalar_prefetch = 0 : i64, scratch_operands = 0 : i64, tpu.core_type = #tpu.core_type<tc>, window_params = [{transform_indices = @transform_0, window_bounds = array<i64: 8, 128>}, {transform_indices = @transform_1, window_bounds = array<i64: 8, 128>}, {transform_indices = @transform_2, window_bounds = array<i64: 1, 8, 128>}]} {
    %c0_i32 = arith.constant 0 : i32
    %0 = arith.cmpi eq, %arg1, %c0_i32 : i32
    %1 = arith.extui %0 : i1 to i32
    %c0_i32_0 = arith.constant 0 : i32
    %2 = arith.cmpi ne, %1, %c0_i32_0 : i32
    scf.if %2 {
      %cst_18 = arith.constant 0.000000e+00 : f32
      %42 = vector.broadcast %cst_18 : f32 to vector<1x8x128xf32>
      %c0_19 = arith.constant 0 : index
      %c0_20 = arith.constant 0 : index
      %c0_21 = arith.constant 0 : index
      %43 = vector.load %arg4[%c0_19, %c0_20, %c0_21] : memref<1x8x128xf32, #tpu.memory_space<vmem>>, vector<1x8x128xf32>
      tpu.vector_store %arg4[%c0_19, %c0_20, %c0_21], %42 {strides = array<i32>} : memref<1x8x128xf32, #tpu.memory_space<vmem>>, vector<1x8x128xf32>,
    } else {
    }
    %cst = arith.constant 0.000000e+00 : f32
    %3 = vector.broadcast %cst : f32 to vector<8x128xf32>
    %c0 = arith.constant 0 : index
    %c0_1 = arith.constant 0 : index
    %4 = vector.load %arg2[%c0, %c0_1] : memref<8x128xf32, #tpu.memory_space<vmem>>, vector<8x128xf32>
    %c0_2 = arith.constant 0 : index
    %c0_3 = arith.constant 0 : index
    %5 = vector.load %arg3[%c0_2, %c0_3] : memref<8x128xf32, #tpu.memory_space<vmem>>, vector<8x128xf32>
    %6 = math.absf %4 : vector<8x128xf32>
    %cst_4 = arith.constant 0.000000e+00 : f32
    %7 = vector.broadcast %cst_4 : f32 to vector<8x128xf32>
    %8 = arith.subf %7, %6 : vector<8x128xf32>
    %9 = math.exp %8 : vector<8x128xf32>
    %10 = math.log1p %9 : vector<8x128xf32>
    %cst_5 = arith.constant 0.000000e+00 : f32
    %11 = vector.broadcast %cst_5 : f32 to vector<8x128xf32>
    %12 = arith.cmpf oge, %4, %11 : vector<8x128xf32>
    %cst_6 = arith.constant 1.000000e+00 : f32
    %13 = vector.broadcast %cst_6 : f32 to vector<8x128xf32>
    %14 = arith.select %12, %13, %9 : vector<8x128xi1>, vector<8x128xf32>
    %cst_7 = arith.constant 1.000000e+00 : f32
    %15 = vector.broadcast %cst_7 : f32 to vector<8x128xf32>
    %16 = arith.addf %15, %9 : vector<8x128xf32>
    %17 = tpu.reciprocal %16 {approx = true} : vector<8x128xf32> -> vector<8x128xf32>
    %18 = arith.mulf %14, %17 : vector<8x128xf32>
    %19 = arith.subf %18, %5 : vector<8x128xf32>
    %20 = math.absf %19 : vector<8x128xf32>
    %21 = arith.mulf %20, %20 : vector<8x128xf32>
    %cst_8 = arith.constant 0.000000e+00 : f32
    %22 = vector.broadcast %cst_8 : f32 to vector<8x128xf32>
    %23 = arith.cmpf ogt, %5, %22 : vector<8x128xf32>
    %cst_9 = arith.constant 7.500000e-01 : f32
    %24 = vector.broadcast %cst_9 : f32 to vector<8x128xf32>
    %25 = arith.mulf %24, %21 : vector<8x128xf32>
    %26 = arith.select %23, %5, %25 : vector<8x128xi1>, vector<8x128xf32>
    %cst_10 = arith.constant 0.000000e+00 : f32
    %27 = vector.broadcast %cst_10 : f32 to vector<8x128xf32>
    %28 = arith.maximumf %4, %27 : vector<8x128xf32>
    %29 = arith.mulf %4, %5 : vector<8x128xf32>
    %30 = arith.subf %28, %29 : vector<8x128xf32>
    %31 = arith.addf %30, %10 : vector<8x128xf32>
    %32 = arith.mulf %31, %26 : vector<8x128xf32>
    %33 = vector.shape_cast %32 : vector<8x128xf32> to vector<1x8x128xf32>
    %cst_11 = arith.constant dense<0.000000e+00> : vector<8x128xf32>
    %34 = vector.multi_reduction <add>, %33, %cst_11 [0] : vector<1x8x128xf32> to vector<8x128xf32>
    %35 = arith.addf %3, %34 : vector<8x128xf32>
    %c0_12 = arith.constant 0 : index
    %c0_13 = arith.constant 0 : index
    %c0_14 = arith.constant 0 : index
    %36 = vector.load %arg4[%c0_12, %c0_13, %c0_14] : memref<1x8x128xf32, #tpu.memory_space<vmem>>, vector<1x8x128xf32>
    %37 = vector.shape_cast %36 : vector<1x8x128xf32> to vector<8x128xf32>
    %38 = arith.addf %37, %35 : vector<8x128xf32>
    %c0_15 = arith.constant 0 : index
    %c0_16 = arith.constant 0 : index
    %c0_17 = arith.constant 0 : index
    %39 = vector.load %arg4[%c0_15, %c0_16, %c0_17] : memref<1x8x128xf32, #tpu.memory_space<vmem>>, vector<1x8x128xf32>
    %40 = vector.shape_cast %39 : vector<1x8x128xf32> to vector<8x128xf32>
    %41 = vector.shape_cast %38 : vector<8x128xf32> to vector<1x8x128xf32>
    tpu.vector_store %arg4[%c0_15, %c0_16, %c0_17], %41 {strides = array<i32>} : memref<1x8x128xf32, #tpu.memory_space<vmem>>, vector<1x8x128xf32>,
    return
  }
  func.func @transform_0(%arg0: i32, %arg1: i32) -> (i32, i32) {
    %c1_i32 = arith.constant 1 : i32
    %0 = arith.muli %arg0, %c1_i32 : i32
    %1 = arith.addi %0, %arg1 : i32
    %c0_i32 = arith.constant 0 : i32
    %c0_i32_0 = arith.constant 0 : i32
    return %1, %c0_i32 : i32, i32
  }
  func.func @transform_1(%arg0: i32, %arg1: i32) -> (i32, i32) {
    %c1_i32 = arith.constant 1 : i32
    %0 = arith.muli %arg0, %c1_i32 : i32
    %1 = arith.addi %0, %arg1 : i32
    %c0_i32 = arith.constant 0 : i32
    %c0_i32_0 = arith.constant 0 : i32
    return %1, %c0_i32 : i32, i32
  }
  func.func @transform_2(%arg0: i32, %arg1: i32) -> (i32, i32, i32) {
    %c0_i32 = arith.constant 0 : i32
    %c0_i32_0 = arith.constant 0 : i32
    %c0_i32_1 = arith.constant 0 : i32
    return %arg0, %c0_i32, %c0_i32_0 : i32, i32, i32
  }
}

</mosaic_0001>

<bundles_post_ra>
// kernel: tpu_custom_call.1
= control target key start
LH: loop header
LB: loop body
LE: loop exit
PB: predicated region body
PF: predicated region fallthrough
CT: control target
= control target key end

     0   :  { %7 = vsyncpa [#allocation3], 0  ;;  %s855_s0 = inlined_call_operand.hbm [shape: f32[16,128], index: 0, kind: input, shape index: {}]   ;;  %s856_s1 = inlined_call_operand.hbm [shape: f32[16,128], index: 1, kind: input, shape index: {}]   ;;  %s857_s2 = inlined_call_operand.hbm [shape: f32[2,8,128], index: 2, kind: output, shape index: {}]  }
   0x1   :  { %9 = vsyncpa [#allocation3 + $0x1], 0 }
   0x2   :  { %10 = vsyncpa [#allocation6], 0 }
   0x3   :  { %12 = vsyncpa [#allocation6 + $0x1], 0 }
   0x4   :  { %13 = vsyncpa [#allocation4], 0 }
   0x5   :  { %15 = vsyncpa [#allocation4 + $0x1], 0  ;;  %s630_s9 = smov 0   ;;  %s632_s10 = smov 0  }
   0x6   :  { %s634_s11 = smov 0   ;;  %s636_s12 = smov 0  }
   0x7   :  { %s638_s13 = smov 0   ;;  %s640_s14 = smov 0  }
   0x8 LB: > { %s374_s15 = sadd.s32 4294967295, %s610_s14   ;;  %s375_s16 = sadd.s32 4294967294, %s610_s14   ;;  %s610_s14 = sphi %s640_s14, %s21_s14   ;;  %s606_s13 = sphi %s638_s13, %s877_s13   ;;  %s602_s12 = sphi %s636_s12, %s876_s12   ;;  %s598_s11 = sphi %s634_s11, %s875_s11   ;;  %s594_s10 = sphi %s632_s10, %s874_s10   ;;  %s590_s9 = sphi %s630_s9, %s873_s9  }
   0x9   : > { %s33_s17 = sadd.s32 1, %s606_s13  ;;  %s42_s18 = sadd.s32 1, %s598_s11 }
   0xa   : > { %p35_p0 = scmp.ge.s32.totalorder %s33_s17, 2  ;;  %p49_p1 = scmp.ne.s32.totalorder %s598_s11, %s594_s10 }
   0xb   : > { %p50_p2 = scmp.eq.s32.totalorder %s610_s14, 0  ;;  %p55_p3 = scmp.ne.s32.totalorder %s594_s10, %s590_s9 }
   0xc   : > { %s879_s17 = smov (%p35_p0, %s33_s17), 0  ;;  %p56_p5 = scmp.eq.s32.totalorder %s374_s15, 0 }
   0xd   : > { %p671_p4 = por %p50_p2, %p49_p1  ;;  %s39_s20 = ssub.s32 %s606_s13, %s879_s17 }
   0xe   : > { %p107_p6 = scmp.eq.s32.totalorder %s374_s15, 1  ;;  %p40_p7 = scmp.eq.s32.totalorder %s39_s20, 0 }
   0xf   : > { %p677_p8 = por %p56_p5, %p55_p3  ;;  %p113_p10 = scmp.eq.s32.totalorder %s375_s16, 1 }
  0x10   : > { %p681_p9 = por %p107_p6, %p49_p1  ;;  %p407_p13 = scmp.lt.s32.totalorder %s610_s14, 2 }
  0x11   : > { %s861_s21 = scalar_select %p677_p8, 1, 0 }
  0x12   : > { %s862_s22 = scalar_select %p681_p9, 1, 0 }
  0x13   : > { %s686_s23 = scalar_select %p40_p7, %s598_s11, %s42_s18  }
  0x14   : > { %p688_p11 = por %p113_p10, %p55_p3  ;;  %s695_s25 = sand.u32 1, %s598_s11  }
  0x15   : > { %s378_s26 = sshll.u32 %s695_s25, 3  ;;  %s379_s27 = sshll.u32 %s606_s13, 7 }
  0x16   : > { %s863_s24 = scalar_select %p688_p11, 1, 0 }
  0x17   : > { %s704_s30 = scalar_lea.hbm %s855_s0, %s379_s27  ;;  %s137_s3 = scalar_lea.vmem [#allocation2], %s378_s26 }
  0x18   : > { %s145_s4 = sshll.u32 %s137_s3, 4  ;;  %p712_p0 = pnand %p407_p13, %p671_p4  ;;  %s708_s4 = int_to_ptr.vmem [resolvable:$true] %s145_s4 }
  0x19   : > { %s134_s6 = scalar_lea.sflag [#allocation3], %s695_s25  ;;  %s464_s7 = scalar_lea.hbm %s704_s30, 128 }
  0x1a   : > { %p465_p3 = scmp.ne.s32.totalorder %s704_s30, %s464_s7  ;;  %p466_p5 = pneg %p712_p0 }
  0x1b   : > { %s469_s16 = scalar_lea.hbm %s855_s0, 256  ;;  %p470_p4 = scmp.lt.u32.totalorder %s704_s30, %s855_s0 }
  0x1c   : > { %p467_p6 = pnand %p466_p5, %p465_p3  ;;  %p471_p10 = scmp.lt.u32.totalorder %s469_s16, %s464_s7 }
  0x1d   : > { %p473_p12 = scmp.lt.u32.totalorder %s464_s7, %s704_s30 }
  0x1e   : > { %p468_p7 = pneg %p467_p6  ;;  %p472_p13 = por %p471_p10, %p470_p4 }
  0x20   : > { %p474_p1 = por %p473_p12, %p472_p13 }
  0x22   : > { %p475_p2 = pnand %p474_p1, %p468_p7 }
  0x24   : > { %478 = shalt.err (!%p475_p2)
}
  0x25   : > { %s479_s20 = scalar_lea.vmem %s708_s4, 128  ;;  %s612_s28 = smov [#allocation2]  }
  0x26   : > { %p480_p3 = scmp.ne.s32.totalorder %s708_s4, %s479_s20  ;;  %s484_s29 = sshll.u32 %s612_s28, 4  ;;  %s485_s29 = int_to_ptr.vmem [resolvable:$false] %s484_s29 }
  0x27   : > { %s486_s3 = scalar_lea.vmem %s485_s29, 256  ;;  %p487_p9 = scmp.lt.s32.totalorder %s708_s4, %s485_s29 }
  0x28   : > { %p482_p6 = pnand %p480_p3, %p466_p5  ;;  %p488_p4 = scmp.lt.s32.totalorder %s486_s3, %s479_s20 }
  0x2a   : > { %p483_p11 = pneg %p482_p6  ;;  %p489_p10 = por %p488_p4, %p487_p9 }
  0x2c   : > { %p490_p12 = pnand %p489_p10, %p483_p11 }
  0x2e   : > { %493 = shalt.err (!%p490_p12)
}
  0x2f   : > { %399 = dma.hbm_to_vmem [thread:$0]  (!%p712_p0), %s704_s30, 128, %s708_s4, %s134_s6  }
  0x30   : > { %p865_p1 = scmp.lt.s32.totalorder %s610_s14, 3  ;;  %p866_p2 = scmp.ge.s32.totalorder %s610_s14, 1 }
  0x31   : > { %s757_s16 = scalar_lea.hbm %s856_s1, %s379_s27  ;;  %s156_s18 = scalar_lea.vmem [#allocation5], %s378_s26 }
  0x32   : > { %p748_p7 = pnand %p866_p2, %p865_p1  ;;  %s164_s19 = sshll.u32 %s156_s18, 4  ;;  %s165_s19 = int_to_ptr.vmem [resolvable:$true] %s164_s19 }
  0x33   : > { %s153_s30 = scalar_lea.sflag [#allocation6], %s695_s25  ;;  %s494_s4 = scalar_lea.hbm %s757_s16, 128 }
  0x34   : > { %s867_s7 = scalar_select %p748_p7, 1, 0 }
  0x35   : > { %p495_p9 = scmp.ne.s32.totalorder %s757_s16, %s494_s4  ;;  %s499_s27 = scalar_lea.hbm %s856_s1, 256 }
  0x36   : > { %p500_p3 = scmp.lt.u32.totalorder %s757_s16, %s856_s1  ;;  %p501_p6 = scmp.lt.u32.totalorder %s499_s27, %s494_s4 }
  0x37   : > { %p497_p11 = pnand %p495_p9, %p466_p5  ;;  %p503_p10 = scmp.lt.u32.totalorder %s494_s4, %s757_s16 }
  0x38   : > { %p502_p4 = por %p501_p6, %p500_p3 }
  0x39   : > { %p498_p13 = pneg %p497_p11 }
  0x3a   : > { %p504_p12 = por %p503_p10, %p502_p4 }
  0x3c   : > { %p505_p1 = pnand %p504_p12, %p498_p13 }
  0x3e   : > { %508 = shalt.err (!%p505_p1)
}
  0x3f   : > { %s509_s25 = scalar_lea.vmem %s165_s19, 128  ;;  %s613_s26 = smov [#allocation5]  }
  0x40   : > { %p510_p2 = scmp.ne.s32.totalorder %s165_s19, %s509_s25  ;;  %s514_s3 = sshll.u32 %s613_s26, 4  ;;  %s515_s3 = int_to_ptr.vmem [resolvable:$false] %s514_s3 }
  0x41   : > { %s516_s8 = scalar_lea.vmem %s515_s3, 256  ;;  %p517_p8 = scmp.lt.s32.totalorder %s165_s19, %s515_s3 }
  0x42   : > { %p512_p9 = pnand %p510_p2, %p466_p5  ;;  %p518_p7 = scmp.lt.s32.totalorder %s516_s8, %s509_s25 }
  0x44   : > { %p513_p11 = pneg %p512_p9  ;;  %p519_p3 = por %p518_p7, %p517_p8 }
  0x46   : > { %p520_p6 = pnand %p519_p3, %p513_p11 }
  0x48   : > { %523 = shalt.err (!%p520_p6)
}
  0x49   : > { %402 = dma.hbm_to_vmem [thread:$0]  (!%p712_p0), %s757_s16, 128, %s165_s19, %s153_s30  }
  0x4a   : > { %p868_p13 = scmp.ne.s32.totalorder %s867_s7, 0 }
  0x4b   : > { %s784_s15 = sand.u32 (!%p868_p13), 1, %s594_s10   ;;  %p869_p8 = scmp.ne.s32.totalorder (!%p868_p13), %s861_s21, 0 }
  0x4c   : > { %173 = sbr.rel (%p868_p13) target bundleno = 145 (0x91), region = 28  ;;  %s787_s18 = sshll.u32 (!%p868_p13), %s784_s15, 3 }
  0x4d   : > { %s176_s4 = scalar_lea.sflag (!%p868_p13), [#allocation3], %s784_s15  ;;  %s179_s6 = scalar_lea.vmem (!%p868_p13), [#allocation2], %s787_s18 }
  0x53   : > { %577 = dma.done.wait (%p869_p8), %s176_s4, 128  }
  0x54   : > { %579 = vsyncadd (%p869_p8), %s176_s4, 4294967168  ;;  %s185_s5 = scalar_lea.sflag [#allocation6], %s784_s15  ;;  %s188_s7 = scalar_lea.vmem [#allocation5], %s787_s18 }
  0x55   : > { %581 = dma.done.wait (%p869_p8), %s185_s5, 128  }
  0x56   : > { %583 = vsyncadd (%p869_p8), %s185_s5, 4294967168  ;;  %v221_v0 = vld [vmem:[%s179_s6] sm:$0xff]  ;;  %v222_v11 = vld [vmem:[%s188_s7] sm:$0xff]  ;;  %s387_s21 = sshll.u32 %s602_s12, 7  ;;  %s213_s16 = scalar_lea.vmem [#allocation7], %s787_s18 }
  0x57   : > { %v223_v1 = vand.u32 2147483647, %v221_v0  ;;  %vm236_vm0 = vcmp.ge.f32.partialorder %v221_v0, 0.0  ;;  %v247_v13 = vmax.f32 %v221_v0, 0.0  ;;  %v248_v14 = vmul.f32 %v222_v11, %v221_v0  ;;  %s271_s19 = sshll.u32 %s213_s16, 4  ;;  %s806_s27 = scalar_lea.hbm %s857_s2, %s387_s21  ;;  %s808_s19 = int_to_ptr.vmem [resolvable:$true] %s271_s19 }
  0x58   : > { %vm244_vm2 = vcmp.gt.f32.partialorder %v222_v11, 0.0  ;;  %s258_s28 = scalar_lea.sflag [#allocation4], %s784_s15  ;;  %s524_s29 = scalar_lea.vmem %s808_s19, 128 }
  0x59   : > { %v224_v2 = vsub.f32 0.0, %v223_v1  ;;  %v249_v19 = vsub.f32 %v247_v13, %v248_v14  ;;  %p525_p0 = scmp.ne.s32.totalorder %s808_s19, %s524_s29  ;;  %p870_p5 = scmp.ne.s32.totalorder %s862_s22, 0 }
  0x5a   : > { %s614_s12 = smov [#allocation7]  }
  0x5b   : > { %v225_v3 = vmul.f32 1.442695, %v224_v2  ;;  %p526_p7 = pnand %p525_p0, %p870_p5  ;;  %s528_s25 = sshll.u32 %s614_s12, 4  ;;  %s529_s25 = int_to_ptr.vmem [resolvable:$false] %s528_s25 }
  0x5c   : > { %s530_s26 = scalar_lea.vmem %s529_s25, 256  ;;  %p531_p10 = scmp.lt.s32.totalorder %s808_s19, %s529_s25 }
  0x5d   : > { %458 = vpow2.f32 %v225_v3  ;;  %p527_p4 = pneg %p526_p7  ;;  %p532_p12 = scmp.lt.s32.totalorder %s530_s26, %s524_s29 }
  0x5f   : > { %p533_p1 = por %p532_p12, %p531_p10 }
  0x61   : > { %p534_p2 = pnand %p533_p1, %p527_p4 }
  0x67   : > { %v459_v4 = vpop.eup %458 }
  0x68   : > { %v227_v5 = vadd.f32 1.0, %v459_v4  ;;  %v230_v6 = vmul.f32 -0.5, %v459_v4  ;;  %v233_v8 = vand.u32 2147483647, %v459_v4  ;;  %v237_v9 = vsel %vm236_vm0, 1.0, %v459_v4 }
  0x6a   : > { %460 = vlog2.f32 %v227_v5  ;;  %v231_v7 = vadd.f32 1.0, %v230_v6  ;;  %vm234_vm1 = vcmp.lt.f32.partialorder %v233_v8, 0.0004427343 }
  0x6b   : > { %462 = vrcp.f32 %v227_v5 }
  0x6c   : > { %v232_v16 = vmul.f32 %v459_v4, %v231_v7 }
  0x74   : > { %v461_v10 = vpop.eup %460 }
  0x75   : > { %v463_v12 = vpop.eup %462  ;;  %v229_v15 = vmul.f32 0.6931472, %v461_v10 }
  0x76   : > { %v240_v17 = vmul.f32 %v463_v12, %v237_v9 }
  0x77   : > { %v235_v20 = vsel %vm234_vm1, %v232_v16, %v229_v15 }
  0x78   : > { %v241_v18 = vsub.f32 %v240_v17, %v222_v11  ;;  %v250_v23 = vadd.f32 %v249_v19, %v235_v20 }
  0x7a   : > { %v242_v21 = vand.u32 2147483647, %v241_v18 }
  0x7c   : > { %v243_v22 = vmul.f32 %v242_v21, %v242_v21 }
  0x7e   : > { %v245_v24 = vmul.f32 0.75, %v243_v22 }
  0x80   : > { %v246_v25 = vsel %vm244_vm2, %v222_v11, %v245_v24 }
  0x81   : > { %v251_v26 = vmul.f32 %v250_v23, %v246_v25 }
  0x83   : > { %256 = vst [vmem:[%s213_s16] sm:$0xff] %v251_v26 }
  0x84   : > { %537 = shalt.err (!%p534_p2)
}
  0x85   : > { %s538_s3 = scalar_lea.hbm %s806_s27, 128  ;;  %s542_s18 = scalar_lea.hbm %s857_s2, 256 }
  0x86   : > { %p539_p9 = scmp.ne.s32.totalorder %s806_s27, %s538_s3  ;;  %p543_p6 = scmp.lt.u32.totalorder %s806_s27, %s857_s2 }
  0x87   : > { %p544_p13 = scmp.lt.u32.totalorder %s542_s18, %s538_s3  ;;  %p546_p0 = scmp.lt.u32.totalorder %s538_s3, %s806_s27 }
  0x88   : > { %p540_p11 = pnand %p539_p9, %p870_p5 }
  0x89   : > { %p545_p8 = por %p544_p13, %p543_p6 }
  0x8a   : > { %p541_p3 = pneg %p540_p11 }
  0x8b   : > { %p547_p7 = por %p546_p0, %p545_p8 }
  0x8d   : > { %p548_p4 = pnand %p547_p7, %p541_p3 }
  0x8f   : > { %551 = shalt.err (!%p548_p4)
}
  0x90   : > { %394 = dma.vmem_to_hbm [thread:$0]  (%p870_p5), %s808_s19, 128, %s806_s27, %s258_s28  }
  0x91 PF: > { %s283_s5 = sand.u32 1, %s590_s9   ;;  %p871_p10 = scmp.ne.s32.totalorder %s863_s24, 0 }
  0x92   : > { %p872_p12 = scmp.ge.s32.totalorder %s610_s14, 2  ;;  %s284_s7 = scalar_lea.sflag [#allocation4], %s283_s5 }
  0x94   : > { %p404_p1 = pnand %p872_p12, %p871_p10 }
  0x96   : > { %585 = dma.done.wait (!%p404_p1), %s284_s7, 128  }
  0x97   : > { %587 = vsyncadd (!%p404_p1), %s284_s7, 4294967168  ;;  %s21_s14 = sadd.s32 1, %s610_s14   ;;  %s873_s9 = smov %s594_s10 }
  0x98   : > { %p18_p2 = scmp.ge.s32.totalorder %s21_s14, 4   ;;  %s874_s10 = smov %s598_s11 }
  0x99   : > { %s875_s11 = smov %s686_s23  ;;  %s876_s12 = smov %s606_s13 }
  0x9a   : > { %s877_s13 = smov %s879_s17  ;;  %20 = sbr.rel (!%p18_p2) target bundleno = 8 (0x8), region = 90 }
  0xa1   :  { %289 = vsyncpa [#allocation3], 1 }
  0xa2   :  { %291 = vsyncpa [#allocation3 + $0x1], 1 }
  0xa3   :  { %292 = vsyncpa [#allocation6], 1 }
  0xa4   :  { %294 = vsyncpa [#allocation6 + $0x1], 1 }
  0xa5   :  { %295 = vsyncpa [#allocation4], 1 }
  0xa6   :  { %297 = vsyncpa [#allocation4 + $0x1], 1 }

</bundles_post_ra>
